<compile_context>
chip_gen: v5e
topology: v5e:2x2
jax: 0.10.0
libtpu: 0.0.40
codegen_flags: <defaults>
</compile_context>

<pallas_src>
import functools

import jax
import jax.numpy as jnp
from jax.experimental import pallas as pl
from jax.experimental.pallas import tpu as pltpu

_LANE = 128   # vreg lane width (last dim)
_ROW = 16     # bf16 sublane packing: 16 rows / vreg -> batch tiles are 16-row multiples


def _round_up(x, m):
    return ((x + m - 1) // m) * m


def _check_int(arg, n_min, desc):
    if not isinstance(arg, int) or arg < n_min:
        raise ValueError(f'Integer {desc} must be >= {n_min} (got {arg})')
    return arg


# ----------------------------- Pallas kernels ------------------------------

def _featurize_kernel(x_ref, wf_ref, bf_ref, feat_ref):
    """feat = relu(x @ Wf + bf); x arrives f32 and is cast to bf16 on-chip."""
    xb = x_ref[...].astype(jnp.bfloat16)
    feat = jnp.dot(xb, wf_ref[...], preferred_element_type=jnp.float32)
    feat = jnp.maximum(feat + bf_ref[...], 0.0)           # f32 epilogue (v5e-friendly)
    feat_ref[...] = feat.astype(feat_ref.dtype)           # single cast at the bf16 store


def _head_kernel(x_ref, wf_ref, bf_ref, wh_ref, bh_ref, head_ref):
    """head = relu(x @ Wf + bf) @ Wh + bh.

    The intermediate features never leave VMEM (no discarded feat writeback on
    the classify / forecast paths); the bf16 cast of the features happens once
    and is reused as the LHS of the second MXU pass.
    """
    xb = x_ref[...].astype(jnp.bfloat16)
    feat = jnp.dot(xb, wf_ref[...], preferred_element_type=jnp.float32)
    featb = jnp.maximum(feat + bf_ref[...], 0.0).astype(jnp.bfloat16)
    head = jnp.dot(featb, wh_ref[...], preferred_element_type=jnp.float32)
    head_ref[...] = (head + bh_ref[...]).astype(head_ref.dtype)


# ----------------------------- pallas_call glue -----------------------------

@functools.lru_cache(maxsize=None)
def _vmem_limit_bytes():
    # Per-generation cap: ~32 MiB on v7x (64 MiB physical per TC), 64 MiB on v5e/v6e.
    try:
        phys = int(getattr(pltpu.get_tpu_info(), "vmem_capacity_bytes", 128 << 20))
    except Exception:
        phys = 128 << 20
    return int(min(64 << 20, phys // 2))


def _compiler_params():
    return pltpu.CompilerParams(
        dimension_semantics=("parallel",),    # batch axis -> both TensorCores on v7x
        vmem_limit_bytes=_vmem_limit_bytes())


def _pick_tile_b(b, in_dim, nf_pad, out_cols):
    """Batch tile: 16-row multiple, VMEM-budgeted, >=2 grid steps when B allows."""
    per_row = 2 * (in_dim * 4 + out_cols * 2) + nf_pad * 4   # dbl-buffered x/out + f32 feat temp
    cap = min(2048, max(_ROW, ((8 << 20) // per_row) // _ROW * _ROW))
    want = _round_up(max(1, (b + 1) // 2), _ROW)
    return max(_ROW, min(cap, want))


def _run_featurize(x2d, wf, bf, tile_b):
    b, in_dim = x2d.shape
    nf = wf.shape[1]
    cost = pl.CostEstimate(
        flops=2 * b * in_dim * nf, transcendentals=0,
        bytes_accessed=int(b * in_dim * 4 + wf.size * 2 + bf.size * 4 + b * nf * 2))
    return pl.pallas_call(
        _featurize_kernel,
        out_shape=jax.ShapeDtypeStruct((b, nf), jnp.bfloat16),   # bf16 output: half the store bytes
        grid=(pl.cdiv(b, tile_b),),                              # ragged last block handled by Pallas
        in_specs=[
            pl.BlockSpec((tile_b, in_dim), lambda i: (i, 0)),    # pipelined f32 x tile
            pl.BlockSpec(wf.shape, lambda i: (0, 0)),            # VMEM-resident weights
            pl.BlockSpec(bf.shape, lambda i: (0, 0)),
        ],
        out_specs=pl.BlockSpec((tile_b, nf), lambda i: (i, 0)),
        compiler_params=_compiler_params(),
        cost_estimate=cost,
    )(x2d, wf, bf)


def _run_head(x2d, wf, bf, wh, bh, tile_b):
    b, in_dim = x2d.shape
    nf = wf.shape[1]
    nh = wh.shape[1]
    cost = pl.CostEstimate(
        flops=2 * b * in_dim * nf + 2 * b * nf * nh, transcendentals=0,
        bytes_accessed=int(b * in_dim * 4 + (wf.size + wh.size) * 2
                           + (bf.size + bh.size) * 4 + b * nh * 2))
    return pl.pallas_call(
        _head_kernel,
        out_shape=jax.ShapeDtypeStruct((b, nh), jnp.bfloat16),
        grid=(pl.cdiv(b, tile_b),),
        in_specs=[
            pl.BlockSpec((tile_b, in_dim), lambda i: (i, 0)),
            pl.BlockSpec(wf.shape, lambda i: (0, 0)),
            pl.BlockSpec(bf.shape, lambda i: (0, 0)),
            pl.BlockSpec(wh.shape, lambda i: (0, 0)),
            pl.BlockSpec(bh.shape, lambda i: (0, 0)),
        ],
        out_specs=pl.BlockSpec((tile_b, nh), lambda i: (i, 0)),
        compiler_params=_compiler_params(),
        cost_estimate=cost,
    )(x2d, wf, bf, wh, bh)


# --------------------------- model (JAX wrapper) ----------------------------

class MultiTaskTimeSeriesModelPallas:
    """JAX/Pallas counterpart of MultiTaskTimeSeriesModel (concrete MLP form).

    forward(x, kind) with x of shape (B, T=n_in, D=space_dim):
      'classify'  -> (B, n_classes)
      'featurize' -> (B, n_features)
      'forecast'  -> (B, n_out, space_dim)
    A task is "prepared" only if its size argument was given (matches the ABC).
    """

    def __init__(self, n_in, space_dim, n_classes=None, n_features=None,
                 n_out=None, *, key):
        _check_int(n_in, 1, 'number of input time steps')
        _check_int(space_dim, 1, 'space dimension')
        if n_classes is None and n_features is None and n_out is None:
            raise ValueError('One of `n_classes`, `n_features`, `n_out` must be non-None')
        if n_classes is not None:
            _check_int(n_classes, 2, 'number of classes')
        if n_features is not None:
            _check_int(n_features, 1, 'number of features')
        if n_out is not None:
            _check_int(n_out, 1, 'number of output time steps')

        self.n_in, self.space_dim = n_in, space_dim
        self.n_classes, self.n_features, self.n_out = n_classes, n_features, n_out
        self.hyperparams = dict(n_in=n_in, space_dim=space_dim, name=self.name(),
                                n_classes=n_classes, n_features=n_features, n_out=n_out)

        # Shared featurizer width: prepared n_features, else the "natural" width.
        self._feat_width = n_features if n_features is not None else self._get_natural_n_features()

        self.in_dim = n_in * space_dim
        # lane-pad the contraction dim only when it is large enough to matter
        self._in_pad = self.in_dim if self.in_dim < _LANE else _round_up(self.in_dim, _LANE)
        self._nf_pad = _round_up(self._feat_width, _LANE)

        keys = jax.random.split(key, 6)

        def _linear(kw, kb, fan_in, fan_out, rows_pad, cols_pad):
            s = 1.0 / float(fan_in) ** 0.5
            w = (jax.random.uniform(kw, (fan_in, fan_out), jnp.float32) * 2 - 1) * s
            bvec = (jax.random.uniform(kb, (1, fan_out), jnp.float32) * 2 - 1) * s
            wp = jnp.zeros((rows_pad, cols_pad), jnp.float32).at[:fan_in, :fan_out].set(w)
            bp = jnp.zeros((1, cols_pad), jnp.float32).at[:, :fan_out].set(bvec)
            return wp.astype(jnp.bfloat16), bp          # bf16 weights, f32 bias

        # featurizer
        self.wf_p, self.bf_p = _linear(keys[0], keys[1], self.in_dim, self._feat_width,
                                       self._in_pad, self._nf_pad)
        # per-task heads (column-sliced so classify never pays forecast columns and vice versa)
        if n_classes is not None:
            self._nc_pad = _round_up(n_classes, _LANE)
            self.wc_p, self.bc_p = _linear(keys[2], keys[3], self._feat_width, n_classes,
                                           self._nf_pad, self._nc_pad)
        if n_out is not None:
            fo = n_out * space_dim
            self._no_pad = _round_up(fo, _LANE)
            self.wo_p, self.bo_p = _linear(keys[4], keys[5], self._feat_width, fo,
                                           self._nf_pad, self._no_pad)

    # ------------------------------ ABC-ish API -----------------------------
    @classmethod
    def name(cls):
        return 'MultiTaskMLP-Pallas'

    def _get_natural_n_features(self):
        return 32

    def is_prepared_to_classify(self):
        return self.n_classes is not None

    def is_prepared_to_featurize(self):
        return self.n_features is not None

    def is_prepared_to_forecast(self):
        return self.n_out is not None

    # ------------------------------ helpers --------------------------------
    def _prep_x(self, x):
        B, T, D = x.shape
        assert T == self.n_in, f'{self.name()} should take {self.n_in} time steps as input'
        assert D == self.space_dim, f'{self.name()} should take inputs with dimension {self.space_dim}'
        xf = jnp.asarray(x, jnp.float32).reshape(B, T * D)   # f32 feed; bf16 cast happens in-kernel
        if self._in_pad != self.in_dim:
            xf = jnp.pad(xf, ((0, 0), (0, self._in_pad - self.in_dim)))
        return xf, B

    # --------------------------- task forwards -----------------------------
    def forward(self, x, kind):
        xf, B = self._prep_x(x)
        if kind == 'classify' and self.n_classes is not None:
            tb = _pick_tile_b(B, self._in_pad, self._nf_pad, self._nc_pad)
            out = _run_head(xf, self.wf_p, self.bf_p, self.wc_p, self.bc_p, tb)
            y = out[:, :self.n_classes].astype(jnp.float32)
            assert y.shape[1] == self.n_classes
            return y
        elif kind == 'featurize' and self.n_features is not None:
            tb = _pick_tile_b(B, self._in_pad, self._nf_pad, self._nf_pad)
            out = _run_featurize(xf, self.wf_p, self.bf_p, tb)
            y = out[:, :self.n_features].astype(jnp.float32)
            assert y.shape[1] == self.n_features
            return y
        elif kind == 'forecast' and self.n_out is not None:
            tb = _pick_tile_b(B, self._in_pad, self._nf_pad, self._no_pad)
            out = _run_head(xf, self.wf_p, self.bf_p, self.wo_p, self.bo_p, tb)
            y = out[:, :self.n_out * self.space_dim].astype(jnp.float32)
            y = y.reshape(B, self.n_out, self.space_dim)
            assert y.shape[1] == self.n_out and y.shape[2] == self.space_dim
            return y
        else:
            raise ValueError(f'{self.name()} is not prepared to {kind}')

    def classify(self, x):
        if not self.is_prepared_to_classify():
            raise ValueError(f'{self.name()} is not prepared to classify')
        logits = self.forward(x, 'classify')
        # log_softmax kept for value-parity with the reference (argmax-invariant, tiny shape)
        return jnp.argmax(jax.nn.log_softmax(logits, axis=1), axis=1)

    def featurize(self, x):
        if not self.is_prepared_to_featurize():
            raise ValueError(f'{self.name()} is not prepared to featurize')
        return self.forward(x, 'featurize')

    def forecast_by_slices(self, x, n):
        if not self.is_prepared_to_forecast():
            raise ValueError(f'{self.name()} is not prepared to forecast')
        B, T, D = x.shape
        assert T == self.n_in, f'{self.name()} should take {self.n_in} time steps as input'
        ts = jnp.asarray(x, jnp.float32)
        for i in range(T, T + n, self.n_out):
            window = ts[:, i - self.n_in:i, :]
            out = self.forward(window, 'forecast')
            take = min(self.n_out, T + n - i)
            ts = jnp.concatenate([ts, out[:, :take, :]], axis=1)
        return ts

    # TODO(synk): freeze/unfreeze_featurizer and register_hyperparams are training/bookkeeping
    # utilities with no forward-pass (and hence no Pallas) equivalent.


# --------------------------------- driver -----------------------------------

def _reference(model, x, kind):
    """Pure-JAX reference mirroring the kernel's bf16-input / f32-accumulate path."""
    B = x.shape[0]
    xf = jnp.asarray(x, jnp.float32).reshape(B, -1)
    if model._in_pad != model.in_dim:
        xf = jnp.pad(xf, ((0, 0), (0, model._in_pad - model.in_dim)))
    xf = xf.astype(jnp.bfloat16).astype(jnp.float32)
    feat = jnp.maximum(xf @ model.wf_p.astype(jnp.float32) + model.bf_p, 0.0)
    if kind == 'featurize':
        return feat[:, :model.n_features]
    featb = feat.astype(jnp.bfloat16).astype(jnp.float32)
    if kind == 'classify':
        h = featb @ model.wc_p.astype(jnp.float32) + model.bc_p
        return h[:, :model.n_classes]
    h = featb @ model.wo_p.astype(jnp.float32) + model.bo_p
    return h[:, :model.n_out * model.space_dim].reshape(B, model.n_out, model.space_dim)


if __name__ == "__main__":
    key = jax.random.PRNGKey(0)
    k_param, k_x, k_x2 = jax.random.split(key, 3)

    B, n_in, space_dim = 2, 8, 4
    n_classes, n_features, n_out = 5, 32, 4

    model = MultiTaskTimeSeriesModelPallas(
        n_in=n_in, space_dim=space_dim, n_classes=n_classes,
        n_features=n_features, n_out=n_out, key=k_param)

    x = jax.random.normal(k_x, (B, n_in, space_dim), jnp.float32)

    feats = jax.block_until_ready(model.forward(x, 'featurize'))
    logits = jax.block_until_ready(model.forward(x, 'classify'))
    fcast = jax.block_until_ready(model.forward(x, 'forecast'))
    labels = jax.block_until_ready(model.classify(x))
    slices = jax.block_until_ready(model.forecast_by_slices(x, 3))

    assert feats.shape == (B, n_features)
    assert logits.shape == (B, n_classes)
    assert fcast.shape == (B, n_out, space_dim)
    assert labels.shape == (B,)
    assert slices.shape == (B, n_in + 3, space_dim)

    tol = dict(atol=2e-2, rtol=2e-2)
    assert jnp.allclose(feats, _reference(model, x, 'featurize'), **tol)
    assert jnp.allclose(logits, _reference(model, x, 'classify'), **tol)
    assert jnp.allclose(fcast, _reference(model, x, 'forecast'), **tol)

    # larger, non-multiple batch -> >1 grid step (megacore) + ragged last block
    B2 = 37
    x2 = jax.random.normal(k_x2, (B2, n_in, space_dim), jnp.float32)
    logits2 = jax.block_until_ready(model.forward(x2, 'classify'))
    assert logits2.shape == (B2, n_classes)
    assert jnp.allclose(logits2, _reference(model, x2, 'classify'), **tol)

    print("KERNEL_OK")
</pallas_src>

<mosaic_0001>
module attributes {stable_mosaic.version = 11 : i64} {
  func.func @_featurize_kernel(%arg0: i32, %arg1: memref<16x32xf32, #tpu.memory_space<vmem>>, %arg2: memref<32x128xbf16, #tpu.memory_space<vmem>>, %arg3: memref<1x128xf32, #tpu.memory_space<vmem>>, %arg4: memref<16x128xbf16, #tpu.memory_space<vmem>>) attributes {dimension_semantics = [#tpu.dimension_semantics<parallel>], iteration_bounds = array<i64: 1>, scalar_prefetch = 0 : i64, scratch_operands = 0 : i64, tpu.core_type = #tpu.core_type<tc>, window_params = [{transform_indices = @transform_0, window_bounds = array<i64: 16, 32>}, {pipeline_mode = #tpu.pipeline_mode<synchronous>, transform_indices = @transform_1, window_bounds = array<i64: 32, 128>}, {pipeline_mode = #tpu.pipeline_mode<synchronous>, transform_indices = @transform_2, window_bounds = array<i64: 1, 128>}, {transform_indices = @transform_3, window_bounds = array<i64: 16, 128>}]} {
    %c0 = arith.constant 0 : index
    %c0_0 = arith.constant 0 : index
    %0 = vector.load %arg1[%c0, %c0_0] : memref<16x32xf32, #tpu.memory_space<vmem>>, vector<16x32xf32>
    %1 = arith.truncf %0 : vector<16x32xf32> to vector<16x32xbf16>
    %c0_1 = arith.constant 0 : index
    %c0_2 = arith.constant 0 : index
    %2 = vector.load %arg2[%c0_1, %c0_2] : memref<32x128xbf16, #tpu.memory_space<vmem>>, vector<32x128xbf16>
    %cst = arith.constant dense<0.000000e+00> : vector<16x128xf32>
    %3 = tpu.matmul %1, %2, %cst {dimension_numbers = #tpu.dot_dimension_numbers<[1], [0], [0], [1], [0, 0, 1, 1], [], []>} : vector<16x32xbf16>, vector<32x128xbf16>, vector<16x128xf32> -> vector<16x128xf32>
    %c0_3 = arith.constant 0 : index
    %c0_4 = arith.constant 0 : index
    %4 = vector.load %arg3[%c0_3, %c0_4] : memref<1x128xf32, #tpu.memory_space<vmem>>, vector<1x128xf32>
    %5 = vector.broadcast %4 : vector<1x128xf32> to vector<16x128xf32>
    %6 = arith.addf %3, %5 : vector<16x128xf32>
    %cst_5 = arith.constant 0.000000e+00 : f32
    %7 = vector.broadcast %cst_5 : f32 to vector<16x128xf32>
    %8 = arith.maximumf %6, %7 : vector<16x128xf32>
    %9 = arith.truncf %8 : vector<16x128xf32> to vector<16x128xbf16>
    %c0_6 = arith.constant 0 : index
    %c0_7 = arith.constant 0 : index
    %10 = vector.load %arg4[%c0_6, %c0_7] : memref<16x128xbf16, #tpu.memory_space<vmem>>, vector<16x128xbf16>
    tpu.vector_store %arg4[%c0_6, %c0_7], %9 {strides = array<i32>} : memref<16x128xbf16, #tpu.memory_space<vmem>>, vector<16x128xbf16>,
    return
  }
  func.func @transform_0(%arg0: i32) -> (i32, i32) {
    %c0_i32 = arith.constant 0 : i32
    %c0_i32_0 = arith.constant 0 : i32
    return %arg0, %c0_i32 : i32, i32
  }
  func.func @transform_1(%arg0: i32) -> (i32, i32) {
    %c0_i32 = arith.constant 0 : i32
    %c0_i32_0 = arith.constant 0 : i32
    %c0_i32_1 = arith.constant 0 : i32
    return %c0_i32, %c0_i32_0 : i32, i32
  }
  func.func @transform_2(%arg0: i32) -> (i32, i32) {
    %c0_i32 = arith.constant 0 : i32
    %c0_i32_0 = arith.constant 0 : i32
    %c0_i32_1 = arith.constant 0 : i32
    return %c0_i32, %c0_i32_0 : i32, i32
  }
  func.func @transform_3(%arg0: i32) -> (i32, i32) {
    %c0_i32 = arith.constant 0 : i32
    %c0_i32_0 = arith.constant 0 : i32
    return %arg0, %c0_i32 : i32, i32
  }
}

</mosaic_0001>

<bundles_post_ra>
// kernel: tpu_custom_call.1
= control target key start
LH: loop header
LB: loop body
LE: loop exit
PB: predicated region body
PF: predicated region fallthrough
CT: control target
= control target key end

     0   :  { %8 = vsyncpa [#allocation3], 0  ;;  %s309_s0 = inlined_call_operand.hbm [shape: f32[2,32], index: 0, kind: input, shape index: {}]   ;;  %s310_s1 = inlined_call_operand.hbm [shape: bf16[32,128], index: 1, kind: input, shape index: {}]   ;;  %s311_s2 = inlined_call_operand.vmem [shape: f32[1,128], index: 2, kind: input, shape index: {}]   ;;  %s312_s3 = inlined_call_operand.hbm [shape: bf16[2,128], index: 3, kind: output, shape index: {}]  }
   0x1   :  { %9 = vsyncpa [#allocation6], 0 }
   0x2   :  { %10 = vsyncpa [#allocation4], 0 }
   0x3   :  { %14 = vsyncadd [#allocation3], 224  ;;  %s15_s14 = sshll.u32 %s309_s0, 4  ;;  %s260_s15 = smov [#allocation2]   ;;  %s16_s14 = int_to_ptr.hbm [resolvable:$true] %s15_s14 }
   0x4   :  { %s17_s16 = sshll.u32 %s260_s15, 4  ;;  %s28_s19 = sshll.u32 %s310_s1, 4  ;;  %s18_s16 = int_to_ptr.vmem [resolvable:$true] %s17_s16  ;;  %s29_s19 = int_to_ptr.hbm [resolvable:$true] %s28_s19 }
   0x5   :  { %s261_s20 = smov 32   ;;  %s262_s21 = smov 2  }
   0x6   :  { %23 = dma.hbm_to_vmem [thread:$0]  %s16_s14, 32, %s18_s16, [#allocation3], %s261_s20, %s261_s20, %s262_s21  }
   0x7   :  { %s263_s22 = smov [#allocation5]   ;;  %s264_s24 = smov 64  }
   0x8   :  { %s30_s23 = sshll.u32 %s263_s22, 4  ;;  %s265_s25 = smov 4   ;;  %s31_s23 = int_to_ptr.vmem [resolvable:$true] %s30_s23 }
   0x9   :  { %36 = dma.hbm_to_vmem [thread:$0]  %s29_s19, 256, %s31_s23, [#allocation6], %s264_s24, %s264_s24, %s265_s25  }
   0xa   :  { %254 = dma.done.wait [#allocation3], 256  }
   0xb   :  { %255 = vsyncadd [#allocation3], 4294967040 }
   0xc   :  { %256 = dma.done.wait [#allocation6], 256  }
   0xd   :  { %257 = vsyncadd [#allocation6], 4294967040  ;;  %v171_v0 = vld [vmem:[#allocation5 + $0x8] sm:$0xff]  ;;  %v170_v1 = vld [vmem:[#allocation5] sm:$0xff]  ;;  %vm71_vm0 = vcmask 261120   ;;  %vm97_vm1 = vcmask 1040384  }
   0xe   :  { %81 = vmatpush.bf16.msra.mxu0 %v171_v0  ;;  %v48_v2 = vld [vmem:[#allocation2] sm:$0xff]  ;;  %v49_v3 = vld [vmem:[#allocation2 + $0x8] sm:$0xff]  ;;  %vm101_vm2 = vcmask 1041409   ;;  %vm105_vm3 = vcmask 1042434   ;;  %vm109_vm4 = vcmask 1043459  }
   0xf   :  { %v50_v4 = vpack.c.bf16 %v49_v3, %v48_v2  ;;  %v181_v5 = vld [vmem:[%s311_s2] ss:$0 sm:$0xff] }
  0x12   :  { %82 = vmatpush.bf16.msra.mxu0 %v170_v1 }
  0x15   :  { %169 = vmatmul.msk.bf16.vlgmr.msra.gmra.mxu0 %vm71_vm0, %v50_v4 }
  0x92   :  { %v84_v6 = vpop.f32.mrf.mxu0 }
  0x93   :  { %v85_v7 = vadd.f32 %v181_v5, %v84_v6 }
  0x95   :  { %v89_v8 = vmax.f32 %v85_v7, 0.0 }
  0x97   :  { %v91_v9 = vpack.c.bf16 %v89_v8, %v89_v8 }
  0x99   :  { %v95_v10 = vrot.slane %v91_v9, 3 }
  0x9a   :  { %v86_v11 = vpop.f32.mrf.mxu0 }
  0x9b   :  { %v100_v12 = vsel %vm97_vm1, %v91_v9, %v95_v10  ;;  %v102_v13 = vsel %vm101_vm2, %v91_v9, %v95_v10  ;;  %v106_v14 = vsel %vm105_vm3, %v91_v9, %v95_v10  ;;  %v110_v15 = vsel %vm109_vm4, %v91_v9, %v95_v10 }
  0x9c   :  { %v104_v16 = vrot.slane %v102_v13, 1  ;;  %v108_v17 = vrot.slane %v106_v14, 2  ;;  %v112_v18 = vrot.slane %v110_v15, 3  ;;  %133 = vst [vmem:[#allocation7] sm:$0x1] %v100_v12  ;;  %v87_v19 = vadd.f32 %v181_v5, %v86_v11 }
  0x9e   :  { %134 = vst [vmem:[#allocation7 + $0x1] sm:$0x1] %v104_v16  ;;  %v90_v20 = vmax.f32 %v87_v19, 0.0 }
  0x9f   :  { %135 = vst [vmem:[#allocation7 + $0x2] sm:$0x1] %v108_v17 }
  0xa0   :  { %136 = vst [vmem:[#allocation7 + $0x3] sm:$0x1] %v112_v18  ;;  %v92_v21 = vpack.c.bf16 %v90_v20, %v90_v20 }
  0xa2   :  { %v96_v22 = vrot.slane %v92_v21, 3 }
  0xa4   :  { %v115_v23 = vsel %vm97_vm1, %v92_v21, %v96_v22  ;;  %v116_v24 = vsel %vm101_vm2, %v92_v21, %v96_v22  ;;  %v119_v25 = vsel %vm105_vm3, %v92_v21, %v96_v22  ;;  %v122_v26 = vsel %vm109_vm4, %v92_v21, %v96_v22 }
  0xa5   :  { %v118_v27 = vrot.slane %v116_v24, 1  ;;  %v121_v28 = vrot.slane %v119_v25, 2  ;;  %v124_v29 = vrot.slane %v122_v26, 3  ;;  %137 = vst [vmem:[#allocation7 + $0x4] sm:$0x1] %v115_v23 }
  0xa7   :  { %138 = vst [vmem:[#allocation7 + $0x5] sm:$0x1] %v118_v27 }
  0xa8   :  { %139 = vst [vmem:[#allocation7 + $0x6] sm:$0x1] %v121_v28 }
  0xa9   :  { %140 = vst [vmem:[#allocation7 + $0x7] sm:$0x1] %v124_v29 }
  0xaa   :  { %144 = vsyncadd [#allocation4], 112  ;;  %s147_s27 = sshll.u32 %s312_s3, 4  ;;  %s266_s28 = smov [#allocation7]   ;;  %s148_s27 = int_to_ptr.hbm [resolvable:$true] %s147_s27 }
  0xab   :  { %s145_s29 = sshll.u32 %s266_s28, 4  ;;  %s267_s30 = smov 16   ;;  %s146_s29 = int_to_ptr.vmem [resolvable:$true] %s145_s29 }
  0xac   :  { %s268_s4 = smov 1  }
  0xad   :  { %153 = dma.vmem_to_hbm [thread:$0]  %s146_s29, 16, %s148_s27, [#allocation4], %s267_s30, %s267_s30, %s268_s4  }
  0xae   :  { %258 = dma.done.wait [#allocation4], 128  }
  0xaf   :  { %259 = vsyncadd [#allocation4], 4294967168 }
  0xb0   :  { %158 = vsyncpa [#allocation3], 1 }
  0xb1   :  { %159 = vsyncpa [#allocation6], 1 }
  0xb2   :  { %160 = vsyncpa [#allocation4], 1 }

</bundles_post_ra>
